<compile_context>
chip_gen: v7x
topology: tpu7x:2x2x1
jax: 0.10.0
libtpu: 0.0.40
codegen_flags: <defaults>
</compile_context>

<pallas_src>
import jax
import jax.numpy as jnp
from jax.experimental import pallas as pl
from jax.experimental.pallas import tpu as pltpu


# ----------------------------------------------------------------------------
# Kernel: one grid step == one batch tile (feature-major: rows on the lane axis).
#   cos,sin = cos/sin(angles)                                (EUP)
#   xw  = W1^T x ; xjw = (W1^T J_in) x                       (MXU, once per tile)
#   h_s = relu(cos_s*xw + sin_s*xjw + b1)                    (VPU, full lane width)
#   hc  = mean_s cos_s*h_s ; hs = mean_s sin_s*h_s           (VPU + major-axis reduce)
#   out = W2^T hc - (J_out W2^T) hs + b2*mean(cos) - (J_out b2)*mean(sin)
#       == mean_s rho_out(g_s)^-1 (W2^T h_s + b2)            (lane-dense store)
# ----------------------------------------------------------------------------
def _group_aug_kernel(ang_ref, x_ref, w1t_ref, w1jt_ref, b1_ref,
                      w2t_ref, w2jt_ref, b2_ref, b2j_ref, o_ref):
    x = x_ref[...]                                   # (d_in, tb)   lanes = batch rows
    ang = ang_ref[...]                               # (ns,  tb)
    cos = jnp.cos(ang)                               # EUP
    sin = jnp.sin(ang)

    # Layer-1 linearity fold: W1^T(cos*x + sin*J_in x) = cos*(W1^T x) + sin*((W1^T J_in) x)
    xw = jnp.dot(w1t_ref[...], x, preferred_element_type=jnp.float32)    # (H, tb)
    xjw = jnp.dot(w1jt_ref[...], x, preferred_element_type=jnp.float32)  # (H, tb)

    c3 = cos[:, None, :]                             # (ns, 1, tb)
    s3 = sin[:, None, :]
    h = jnp.maximum(c3 * xw[None] + s3 * xjw[None] + b1_ref[...][None], 0.0)  # (ns, H, tb)

    # Fold sample mean and rho_out^-1 through the (linear) second layer.
    hc = jnp.mean(c3 * h, axis=0)                    # (H, tb)
    hs = jnp.mean(s3 * h, axis=0)                    # (H, tb)
    cbar = jnp.mean(cos, axis=0, keepdims=True)      # (1, tb)
    sbar = jnp.mean(sin, axis=0, keepdims=True)      # (1, tb)

    out = (jnp.dot(w2t_ref[...], hc, preferred_element_type=jnp.float32)
           - jnp.dot(w2jt_ref[...], hs, preferred_element_type=jnp.float32)
           + b2_ref[...] * cbar
           - b2j_ref[...] * sbar)                    # (d_out, tb) lane-dense
    o_ref[...] = out.astype(o_ref.dtype)


# ----------------------------------------------------------------------------
# Wrapper: parameter transforms (one-time), tiling, pallas_call.
# ----------------------------------------------------------------------------
def _pad_bytes_f32(shape):
    """Bytes of an f32 array padded to (8, 128) tiles on its last two dims."""
    shape = tuple(shape)
    if len(shape) == 1:
        shape = (1,) + shape
    lead = 1
    for s in shape[:-2]:
        lead *= s
    sub = -(-shape[-2] // 8) * 8
    lane = -(-shape[-1] // 128) * 128
    return lead * sub * lane * 4


def _pick_tile(batch):
    """Lane-aligned batch tile; >= 2 grid steps when batch allows (v7x: 2 TCs)."""
    if batch < 256 or batch % 128 != 0:
        return batch                    # single full-batch tile (small / ragged demo sizes)
    t = min(batch // 2, 4096)
    t = (t // 128) * 128
    while batch % t != 0:
        t -= 128
    return max(t, 128)


def group_augmentation_forward(x, angles, j_in, j_out, w1, b1, w2, b2, *, tile_b=None):
    """Training-mode forward: mean over n_samples of rho_out(g)^-1 @ MLP(rho_in(g) @ x)."""
    batch, d_in = x.shape
    n_samples = angles.shape[0]
    hidden = w1.shape[1]
    d_out = w2.shape[1]

    # One-time parameter transforms (plain JAX): feature-major weights and J-folded
    # variants so the kernel needs no J matmul / roll and no per-sample layer-2 matmul.
    x_t = x.T                                         # (d_in, batch)
    w1_t = w1.T                                       # (H, d_in)
    w1j_t = w1.T @ j_in                               # W1^T J_in
    w2_t = w2.T                                       # (d_out, H)
    w2j_t = j_out @ w2.T                              # J_out W2^T
    b1_c = b1.reshape(hidden, 1)
    b2_c = b2.reshape(d_out, 1)
    b2j_c = j_out @ b2_c                              # J_out b2

    if tile_b is None:
        tile_b = _pick_tile(batch)
    assert batch % tile_b == 0, "batch must be divisible by tile_b"
    assert tile_b == batch or tile_b % 128 == 0, \
        "tile_b must be a multiple of 128 (lane-dense) or the full batch"
    grid = (batch // tile_b,)

    # VMEM budget (v7x: 64 MiB physical / 32 MiB default scoped): double-buffered
    # streamed blocks + constants + in-kernel intermediates, 2x slack, clamped.
    streamed = 2 * (_pad_bytes_f32((n_samples, tile_b)) + _pad_bytes_f32((d_in, tile_b))
                    + _pad_bytes_f32((d_out, tile_b)))
    consts = 2 * (2 * _pad_bytes_f32((hidden, d_in)) + 2 * _pad_bytes_f32((d_out, hidden))
                  + _pad_bytes_f32((hidden, 1)) + 2 * _pad_bytes_f32((d_out, 1)))
    interm = (3 * _pad_bytes_f32((n_samples, hidden, tile_b))
              + 6 * _pad_bytes_f32((hidden, tile_b)))
    vmem_limit = int(min(max(2 * (streamed + consts + interm), 32 << 20), 64 << 20))

    grid_spec = pltpu.PrefetchScalarGridSpec(
        num_scalar_prefetch=0,
        grid=grid,
        in_specs=[
            pl.BlockSpec((n_samples, tile_b), lambda i: (0, i)),   # angles (ns, batch)
            pl.BlockSpec((d_in, tile_b), lambda i: (0, i)),        # x^T (feature-major)
            pl.BlockSpec((hidden, d_in), lambda i: (0, 0)),        # W1^T
            pl.BlockSpec((hidden, d_in), lambda i: (0, 0)),        # W1^T J_in
            pl.BlockSpec((hidden, 1), lambda i: (0, 0)),           # b1
            pl.BlockSpec((d_out, hidden), lambda i: (0, 0)),       # W2^T
            pl.BlockSpec((d_out, hidden), lambda i: (0, 0)),       # J_out W2^T
            pl.BlockSpec((d_out, 1), lambda i: (0, 0)),            # b2
            pl.BlockSpec((d_out, 1), lambda i: (0, 0)),            # J_out b2
        ],
        out_specs=pl.BlockSpec((d_out, tile_b), lambda i: (0, i)),  # lane-dense output
    )

    out_t = pl.pallas_call(
        _group_aug_kernel,
        out_shape=jax.ShapeDtypeStruct((d_out, batch), jnp.float32),
        grid_spec=grid_spec,
        compiler_params=pltpu.CompilerParams(
            dimension_semantics=("parallel",),       # independent batch tiles
            vmem_limit_bytes=vmem_limit),
    )(angles, x_t, w1_t, w1j_t, b1_c, w2_t, w2j_t, b2_c, b2j_c)

    return out_t.T                                   # (batch, d_out)


# ----------------------------------------------------------------------------
# Glue (plain JAX): rep structure and dense reference mirroring the PyTorch module.
# ----------------------------------------------------------------------------
def make_j(d):
    """J such that rho(th) = cos(th)*I_d + sin(th)*J ; J @ J = -I."""
    m = d // 2
    z = jnp.zeros((m, m), jnp.float32)
    eye = jnp.eye(m, dtype=jnp.float32)
    return jnp.concatenate(
        [jnp.concatenate([z, -eye], axis=1),
         jnp.concatenate([eye, z], axis=1)], axis=0)


def pure_jax_reference(x, angles, j_in, j_out, w1, b1, w2, b2):
    """Dense-rho reference mirroring the PyTorch module (incl. linalg.inv)."""
    n_samples, batch = angles.shape
    d_in = x.shape[1]
    d_out = w2.shape[1]
    xr = jnp.broadcast_to(x[None], (n_samples, batch, d_in)).reshape(-1, d_in)
    th = angles.reshape(-1)
    eye_in = jnp.eye(d_in, dtype=jnp.float32)
    eye_out = jnp.eye(d_out, dtype=jnp.float32)
    rho_in = jnp.cos(th)[:, None, None] * eye_in + jnp.sin(th)[:, None, None] * j_in
    rho_out = jnp.cos(th)[:, None, None] * eye_out + jnp.sin(th)[:, None, None] * j_out
    rho_out_inv = jnp.linalg.inv(rho_out)            # mirrors torch.linalg.inv
    y = jnp.einsum('rij,rj->ri', rho_in, xr)
    h = jax.nn.relu(y @ w1 + b1)
    o = h @ w2 + b2
    z = jnp.einsum('rij,rj->ri', rho_out_inv, o)
    return z.reshape(n_samples, batch, d_out).mean(0)


if __name__ == "__main__":
    key = jax.random.PRNGKey(0)
    k_x, k_g, k_w1, k_b1, k_w2, k_b2 = jax.random.split(key, 6)

    batch, d_in, hidden, d_out, n_samples = 256, 4, 32, 4, 4

    x = jax.random.normal(k_x, (batch, d_in), dtype=jnp.float32)
    # one group sample (angle) per augmented row, sample-major like the module's repeat()
    angles = jax.random.uniform(k_g, (n_samples, batch),
                                minval=0.0, maxval=2.0 * jnp.pi).astype(jnp.float32)

    j_in = make_j(d_in)
    j_out = make_j(d_out)

    # deterministic 2-layer MLP parameters
    w1 = (jax.random.normal(k_w1, (d_in, hidden)) / jnp.sqrt(d_in)).astype(jnp.float32)
    b1 = (0.01 * jax.random.normal(k_b1, (hidden,))).astype(jnp.float32)
    w2 = (jax.random.normal(k_w2, (hidden, d_out)) / jnp.sqrt(hidden)).astype(jnp.float32)
    b2 = (0.01 * jax.random.normal(k_b2, (d_out,))).astype(jnp.float32)

    out = group_augmentation_forward(x, angles, j_in, j_out, w1, b1, w2, b2, tile_b=128)
    out = jax.block_until_ready(out)

    ref = pure_jax_reference(x, angles, j_in, j_out, w1, b1, w2, b2)
    assert out.shape == (batch, d_out)
    assert jnp.allclose(out, ref, atol=1e-4, rtol=1e-4), "mismatch vs reference"

    print("KERNEL_OK")
</pallas_src>

<mosaic_0001>
module attributes {stable_mosaic.version = 11 : i64} {
  func.func @_group_aug_kernel(%arg0: i32, %arg1: memref<4x128xf32, #tpu.memory_space<vmem>>, %arg2: memref<4x128xf32, #tpu.memory_space<vmem>>, %arg3: memref<32x4xf32, #tpu.memory_space<vmem>>, %arg4: memref<32x4xf32, #tpu.memory_space<vmem>>, %arg5: memref<32x1xf32, #tpu.memory_space<vmem>>, %arg6: memref<4x32xf32, #tpu.memory_space<vmem>>, %arg7: memref<4x32xf32, #tpu.memory_space<vmem>>, %arg8: memref<4x1xf32, #tpu.memory_space<vmem>>, %arg9: memref<4x1xf32, #tpu.memory_space<vmem>>, %arg10: memref<4x128xf32, #tpu.memory_space<vmem>>) attributes {dimension_semantics = [#tpu.dimension_semantics<parallel>], iteration_bounds = array<i64: 2>, scalar_prefetch = 0 : i64, scratch_operands = 0 : i64, tpu.core_type = #tpu.core_type<tc>, window_params = [{transform_indices = @transform_0, window_bounds = array<i64: 4, 128>}, {transform_indices = @transform_1, window_bounds = array<i64: 4, 128>}, {pipeline_mode = #tpu.pipeline_mode<synchronous>, transform_indices = @transform_2, window_bounds = array<i64: 32, 4>}, {pipeline_mode = #tpu.pipeline_mode<synchronous>, transform_indices = @transform_3, window_bounds = array<i64: 32, 4>}, {pipeline_mode = #tpu.pipeline_mode<synchronous>, transform_indices = @transform_4, window_bounds = array<i64: 32, 1>}, {pipeline_mode = #tpu.pipeline_mode<synchronous>, transform_indices = @transform_5, window_bounds = array<i64: 4, 32>}, {pipeline_mode = #tpu.pipeline_mode<synchronous>, transform_indices = @transform_6, window_bounds = array<i64: 4, 32>}, {pipeline_mode = #tpu.pipeline_mode<synchronous>, transform_indices = @transform_7, window_bounds = array<i64: 4, 1>}, {pipeline_mode = #tpu.pipeline_mode<synchronous>, transform_indices = @transform_8, window_bounds = array<i64: 4, 1>}, {transform_indices = @transform_9, window_bounds = array<i64: 4, 128>}]} {
    %c0 = arith.constant 0 : index
    %c0_0 = arith.constant 0 : index
    %0 = vector.load %arg2[%c0, %c0_0] : memref<4x128xf32, #tpu.memory_space<vmem>>, vector<4x128xf32>
    %c0_1 = arith.constant 0 : index
    %c0_2 = arith.constant 0 : index
    %1 = vector.load %arg1[%c0_1, %c0_2] : memref<4x128xf32, #tpu.memory_space<vmem>>, vector<4x128xf32>
    %2 = math.cos %1 : vector<4x128xf32>
    %3 = math.sin %1 : vector<4x128xf32>
    %c0_3 = arith.constant 0 : index
    %c0_4 = arith.constant 0 : index
    %4 = vector.load %arg3[%c0_3, %c0_4] : memref<32x4xf32, #tpu.memory_space<vmem>>, vector<32x4xf32>
    %cst = arith.constant dense<0.000000e+00> : vector<32x128xf32>
    %5 = tpu.matmul %4, %0, %cst {dimension_numbers = #tpu.dot_dimension_numbers<[1], [0], [0], [1], [0, 0, 1, 1], [], []>} : vector<32x4xf32>, vector<4x128xf32>, vector<32x128xf32> -> vector<32x128xf32>
    %c0_5 = arith.constant 0 : index
    %c0_6 = arith.constant 0 : index
    %6 = vector.load %arg4[%c0_5, %c0_6] : memref<32x4xf32, #tpu.memory_space<vmem>>, vector<32x4xf32>
    %cst_7 = arith.constant dense<0.000000e+00> : vector<32x128xf32>
    %7 = tpu.matmul %6, %0, %cst_7 {dimension_numbers = #tpu.dot_dimension_numbers<[1], [0], [0], [1], [0, 0, 1, 1], [], []>} : vector<32x4xf32>, vector<4x128xf32>, vector<32x128xf32> -> vector<32x128xf32>
    %8 = vector.shape_cast %2 : vector<4x128xf32> to vector<4x1x128xf32>
    %9 = vector.shape_cast %3 : vector<4x128xf32> to vector<4x1x128xf32>
    %10 = vector.shape_cast %5 : vector<32x128xf32> to vector<1x32x128xf32>
    %11 = vector.broadcast %8 : vector<4x1x128xf32> to vector<4x32x128xf32>
    %12 = vector.broadcast %10 : vector<1x32x128xf32> to vector<4x32x128xf32>
    %13 = arith.mulf %11, %12 : vector<4x32x128xf32>
    %14 = vector.shape_cast %7 : vector<32x128xf32> to vector<1x32x128xf32>
    %15 = vector.broadcast %9 : vector<4x1x128xf32> to vector<4x32x128xf32>
    %16 = vector.broadcast %14 : vector<1x32x128xf32> to vector<4x32x128xf32>
    %17 = arith.mulf %15, %16 : vector<4x32x128xf32>
    %18 = arith.addf %13, %17 : vector<4x32x128xf32>
    %c0_8 = arith.constant 0 : index
    %c0_9 = arith.constant 0 : index
    %19 = vector.load %arg5[%c0_8, %c0_9] : memref<32x1xf32, #tpu.memory_space<vmem>>, vector<32x1xf32>
    %20 = vector.shape_cast %19 : vector<32x1xf32> to vector<1x32x1xf32>
    %21 = vector.broadcast %20 : vector<1x32x1xf32> to vector<4x32x128xf32>
    %22 = arith.addf %18, %21 : vector<4x32x128xf32>
    %cst_10 = arith.constant 0.000000e+00 : f32
    %23 = vector.broadcast %cst_10 : f32 to vector<4x32x128xf32>
    %24 = arith.maximumf %22, %23 : vector<4x32x128xf32>
    %25 = vector.broadcast %8 : vector<4x1x128xf32> to vector<4x32x128xf32>
    %26 = arith.mulf %25, %24 : vector<4x32x128xf32>
    %cst_11 = arith.constant dense<0.000000e+00> : vector<32x128xf32>
    %27 = vector.multi_reduction <add>, %26, %cst_11 [0] : vector<4x32x128xf32> to vector<32x128xf32>
    %cst_12 = arith.constant 4.000000e+00 : f32
    %28 = vector.broadcast %cst_12 : f32 to vector<32x128xf32>
    %29 = arith.divf %27, %28 : vector<32x128xf32>
    %30 = vector.broadcast %9 : vector<4x1x128xf32> to vector<4x32x128xf32>
    %31 = arith.mulf %30, %24 : vector<4x32x128xf32>
    %cst_13 = arith.constant dense<0.000000e+00> : vector<32x128xf32>
    %32 = vector.multi_reduction <add>, %31, %cst_13 [0] : vector<4x32x128xf32> to vector<32x128xf32>
    %cst_14 = arith.constant 4.000000e+00 : f32
    %33 = vector.broadcast %cst_14 : f32 to vector<32x128xf32>
    %34 = arith.divf %32, %33 : vector<32x128xf32>
    %cst_15 = arith.constant dense<0.000000e+00> : vector<128xf32>
    %35 = vector.multi_reduction <add>, %2, %cst_15 [0] : vector<4x128xf32> to vector<128xf32>
    %36 = vector.shape_cast %35 : vector<128xf32> to vector<1x128xf32>
    %cst_16 = arith.constant 4.000000e+00 : f32
    %37 = vector.broadcast %cst_16 : f32 to vector<1x128xf32>
    %38 = arith.divf %36, %37 : vector<1x128xf32>
    %cst_17 = arith.constant dense<0.000000e+00> : vector<128xf32>
    %39 = vector.multi_reduction <add>, %3, %cst_17 [0] : vector<4x128xf32> to vector<128xf32>
    %40 = vector.shape_cast %39 : vector<128xf32> to vector<1x128xf32>
    %cst_18 = arith.constant 4.000000e+00 : f32
    %41 = vector.broadcast %cst_18 : f32 to vector<1x128xf32>
    %42 = arith.divf %40, %41 : vector<1x128xf32>
    %c0_19 = arith.constant 0 : index
    %c0_20 = arith.constant 0 : index
    %43 = vector.load %arg6[%c0_19, %c0_20] : memref<4x32xf32, #tpu.memory_space<vmem>>, vector<4x32xf32>
    %cst_21 = arith.constant dense<0.000000e+00> : vector<4x128xf32>
    %44 = tpu.matmul %43, %29, %cst_21 {dimension_numbers = #tpu.dot_dimension_numbers<[1], [0], [0], [1], [0, 0, 1, 1], [], []>} : vector<4x32xf32>, vector<32x128xf32>, vector<4x128xf32> -> vector<4x128xf32>
    %c0_22 = arith.constant 0 : index
    %c0_23 = arith.constant 0 : index
    %45 = vector.load %arg7[%c0_22, %c0_23] : memref<4x32xf32, #tpu.memory_space<vmem>>, vector<4x32xf32>
    %cst_24 = arith.constant dense<0.000000e+00> : vector<4x128xf32>
    %46 = tpu.matmul %45, %34, %cst_24 {dimension_numbers = #tpu.dot_dimension_numbers<[1], [0], [0], [1], [0, 0, 1, 1], [], []>} : vector<4x32xf32>, vector<32x128xf32>, vector<4x128xf32> -> vector<4x128xf32>
    %47 = arith.subf %44, %46 : vector<4x128xf32>
    %c0_25 = arith.constant 0 : index
    %c0_26 = arith.constant 0 : index
    %48 = vector.load %arg8[%c0_25, %c0_26] : memref<4x1xf32, #tpu.memory_space<vmem>>, vector<4x1xf32>
    %49 = vector.broadcast %48 : vector<4x1xf32> to vector<4x128xf32>
    %50 = vector.broadcast %38 : vector<1x128xf32> to vector<4x128xf32>
    %51 = arith.mulf %49, %50 : vector<4x128xf32>
    %52 = arith.addf %47, %51 : vector<4x128xf32>
    %c0_27 = arith.constant 0 : index
    %c0_28 = arith.constant 0 : index
    %53 = vector.load %arg9[%c0_27, %c0_28] : memref<4x1xf32, #tpu.memory_space<vmem>>, vector<4x1xf32>
    %54 = vector.broadcast %53 : vector<4x1xf32> to vector<4x128xf32>
    %55 = vector.broadcast %42 : vector<1x128xf32> to vector<4x128xf32>
    %56 = arith.mulf %54, %55 : vector<4x128xf32>
    %57 = arith.subf %52, %56 : vector<4x128xf32>
    %c0_29 = arith.constant 0 : index
    %c0_30 = arith.constant 0 : index
    %58 = vector.load %arg10[%c0_29, %c0_30] : memref<4x128xf32, #tpu.memory_space<vmem>>, vector<4x128xf32>
    tpu.vector_store %arg10[%c0_29, %c0_30], %57 {strides = array<i32>} : memref<4x128xf32, #tpu.memory_space<vmem>>, vector<4x128xf32>,
    return
  }
  func.func @transform_0(%arg0: i32) -> (i32, i32) {
    %c0_i32 = arith.constant 0 : i32
    %c0_i32_0 = arith.constant 0 : i32
    return %c0_i32, %arg0 : i32, i32
  }
  func.func @transform_1(%arg0: i32) -> (i32, i32) {
    %c0_i32 = arith.constant 0 : i32
    %c0_i32_0 = arith.constant 0 : i32
    return %c0_i32, %arg0 : i32, i32
  }
  func.func @transform_2(%arg0: i32) -> (i32, i32) {
    %c0_i32 = arith.constant 0 : i32
    %c0_i32_0 = arith.constant 0 : i32
    %c0_i32_1 = arith.constant 0 : i32
    return %c0_i32, %c0_i32_0 : i32, i32
  }
  func.func @transform_3(%arg0: i32) -> (i32, i32) {
    %c0_i32 = arith.constant 0 : i32
    %c0_i32_0 = arith.constant 0 : i32
    %c0_i32_1 = arith.constant 0 : i32
    return %c0_i32, %c0_i32_0 : i32, i32
  }
  func.func @transform_4(%arg0: i32) -> (i32, i32) {
    %c0_i32 = arith.constant 0 : i32
    %c0_i32_0 = arith.constant 0 : i32
    %c0_i32_1 = arith.constant 0 : i32
    return %c0_i32, %c0_i32_0 : i32, i32
  }
  func.func @transform_5(%arg0: i32) -> (i32, i32) {
    %c0_i32 = arith.constant 0 : i32
    %c0_i32_0 = arith.constant 0 : i32
    %c0_i32_1 = arith.constant 0 : i32
    return %c0_i32, %c0_i32_0 : i32, i32
  }
  func.func @transform_6(%arg0: i32) -> (i32, i32) {
    %c0_i32 = arith.constant 0 : i32
    %c0_i32_0 = arith.constant 0 : i32
    %c0_i32_1 = arith.constant 0 : i32
    return %c0_i32, %c0_i32_0 : i32, i32
  }
  func.func @transform_7(%arg0: i32) -> (i32, i32) {
    %c0_i32 = arith.constant 0 : i32
    %c0_i32_0 = arith.constant 0 : i32
    %c0_i32_1 = arith.constant 0 : i32
    return %c0_i32, %c0_i32_0 : i32, i32
  }
  func.func @transform_8(%arg0: i32) -> (i32, i32) {
    %c0_i32 = arith.constant 0 : i32
    %c0_i32_0 = arith.constant 0 : i32
    %c0_i32_1 = arith.constant 0 : i32
    return %c0_i32, %c0_i32_0 : i32, i32
  }
  func.func @transform_9(%arg0: i32) -> (i32, i32) {
    %c0_i32 = arith.constant 0 : i32
    %c0_i32_0 = arith.constant 0 : i32
    return %c0_i32, %arg0 : i32, i32
  }
}

</mosaic_0001>

<bundles_post_ra>
// kernel: tpu_custom_call.1
= control target key start
LH: loop header
LB: loop body
LE: loop exit
PB: predicated region body
PF: predicated region fallthrough
CT: control target
= control target key end

     0   :  { %14 = vsyncpa [#allocation3], 0  ;;  %s1888_s0 = inlined_call_operand.vmem [shape: f32[4,256], index: 0, kind: input, shape index: {}]   ;;  %s1889_s1 = inlined_call_operand.vmem [shape: f32[4,256], index: 1, kind: input, shape index: {}]   ;;  %s1890_s2 = inlined_call_operand.vmem [shape: f32[32,4], index: 2, kind: input, shape index: {}]   ;;  %s1891_s3 = inlined_call_operand.vmem [shape: f32[32,4], index: 3, kind: input, shape index: {}]   ;;  %s1892_s4 = inlined_call_operand.vmem [shape: f32[32,1], index: 4, kind: input, shape index: {}]   ;;  %s1893_s5 = inlined_call_operand.vmem [shape: f32[4,32], index: 5, kind: input, shape index: {}]   ;;  %s1894_s6 = inlined_call_operand.vmem [shape: f32[4,32], index: 6, kind: input, shape index: {}]   ;;  %s1895_s7 = inlined_call_operand.vmem [shape: f32[4,1], index: 7, kind: input, shape index: {}]   ;;  %s1896_s8 = inlined_call_operand.vmem [shape: f32[4,1], index: 8, kind: input, shape index: {}]   ;;  %s1897_s9 = inlined_call_operand.hbm [shape: f32[4,256], index: 9, kind: output, shape index: {}]  }
   0x1   :  { %16 = vsyncpa [#allocation3 + $0x1], 0  ;;  %s1575_s30 = smov 0   ;;  %s1577_s10 = smov 0  }
   0x2   :  { %s1579_s11 = smov 0   ;;  %s1581_s12 = smov 0  }
   0x3 LB: > { %s1596_s13 = sadd.s32 4294967295, %s1511_s12   ;;  %s1288_s14 = sadd.s32 4294967294, %s1511_s12   ;;  %s1511_s12 = sphi %s1581_s12, %s1903_s12   ;;  %s1507_s11 = sphi %s1579_s11, %s1902_s11   ;;  %s1503_s10 = sphi %s1577_s10, %s1901_s10   ;;  %s1499_s30 = sphi %s1575_s30, %s1900_s30  }
   0x4   : > { %s1600_s15 = sadd.s32 1, %s1511_s12   ;;  %s228_s16 = sadd.s32 1, %s1507_s11 }
   0x5   : > { %s225_s17 = ssub.s32 %s1511_s12, %s1600_s15  ;;  %p238_p0 = scmp.ne.s32.totalorder %s1507_s11, %s1503_s10 }
   0x6   : > { %p226_p1 = scmp.eq.s32.totalorder %s225_s17, 0  ;;  %p239_p2 = scmp.eq.s32.totalorder %s1596_s13, 1 }
   0x7   : > { %p244_p3 = scmp.ne.s32.totalorder %s1503_s10, %s1499_s30  ;;  %p245_p4 = scmp.eq.s32.totalorder %s1288_s14, 1 }
   0x8   : > { %s1611_s18 = scalar_select %p226_p1, %s1507_s11, %s228_s16  }
   0x9   : > { %p1613_p5 = por %p239_p2, %p238_p0  ;;  %p1617_p6 = por %p245_p4, %p244_p3 }
   0xa   : > { %p1291_p7 = scmp.ge.s32.totalorder %s1511_s12, 1  ;;  %p298_p8 = scmp.lt.s32.totalorder %s1511_s12, 3 }
   0xc   : > { %p299_p9 = pnand %p1291_p7, %p298_p8 }
   0xd   : > { %p337_p10 = scmp.lt.s32.totalorder (!%p299_p9), %s1596_s13, 1  ;;  %v554_v0 = vld [vmem:[%s1890_s2] sm:$0xff] (!%p299_p9)  ;;  %vm558_vm0 = vcmask (!%p299_p9), 31744   ;;  %vm571_vm1 = vcmask (!%p299_p9), 1043456   ;;  %v555_v2 = vld [vmem:[%s1890_s2 + $0x8] sm:$0xff] (!%p299_p9)  ;;  %v1513_v3 = vmov (!%p299_p9), 0  }
   0xe   : > { %302 = sbr.rel (%p299_p9) target bundleno = 517 (0x205), region = 56  ;;  %v660_v1 = vld [vmem:[%s1891_s3] sm:$0xff] (!%p299_p9)  ;;  %1341 = vmatprep.mubr.msk.f32.mxu0 (!%p299_p9), %vm558_vm0, %v554_v0  ;;  %1443 = vset.pattern.permute.xlu0 (!%p299_p9), %v1513_v3  ;;  %v661_v7 = vld [vmem:[%s1891_s3 + $0x8] sm:$0xff] (!%p299_p9)  ;;  %v556_v9 = vld [vmem:[%s1890_s2 + $0x10] sm:$0xff] (!%p299_p9)  ;;  %v1514_v28 = vmov (!%p299_p9), 683565275  }
   0xf   : > { %1349 = vmatprep.mubr.msk.f32.mxu1 (!%p299_p9), %vm558_vm0, %v660_v1  ;;  %v899_v4 = vld [vmem:[%s1892_s4] sm:$0xff] (!%p299_p9)  ;;  %1444 = vset.pattern.permute.xlu1 (!%p299_p9), %v1513_v3  ;;  %v662_v10 = vld [vmem:[%s1891_s3 + $0x10] sm:$0xff] (!%p299_p9)  ;;  %v900_v12 = vld [vmem:[%s1892_s4 + $0x8] sm:$0xff] (!%p299_p9)  ;;  %v1515_v30 = vmov (!%p299_p9), 2475754826   ;;  %s334_s25 = sand.u32 (!%p299_p9), 1, %s1503_s10  }
  0x10   : > { %905 = vperm.xlu0 (!%p299_p9), %1443, %v899_v4   ;;  %v901_v11 = vld [vmem:[%s1892_s4 + $0x10] sm:$0xff] (!%p299_p9)  ;;  %v557_v15 = vld [vmem:[%s1890_s2 + $0x18] sm:$0xff] (!%p299_p9)  ;;  %v1186_v19 = vld [vmem:[%s1895_s7] sm:$0xf] (!%p299_p9)  ;;  %v1516_v32 = vmov (!%p299_p9), 2131351028  }
  0x11   : > { %v663_v16 = vld [vmem:[%s1891_s3 + $0x18] sm:$0xff] (!%p299_p9)  ;;  %915 = vperm.xlu1 (!%p299_p9), %1444, %v901_v11   ;;  %v1194_v23 = vld [vmem:[%s1896_s8] sm:$0xf] (!%p299_p9)  ;;  %v1517_v34 = vmov (!%p299_p9), 2102212464   ;;  %s1292_s27 = sshll.u32 (!%p299_p9), %s334_s25, 2 }
  0x12   : > { %v902_v18 = vld [vmem:[%s1892_s4 + $0x18] sm:$0xff] (!%p299_p9)  ;;  %v1518_v36 = vmov (!%p299_p9), 920167782   ;;  %v1519_v43 = vmov (!%p299_p9), 1326507024   ;;  %s336_s28 = scalar_lea.vmem (!%p299_p9), [#allocation2], %s1292_s27 }
  0x13   : > { %s1217_s14 = sshll.u32 (!%p299_p9), %s336_s28, 4  ;;  %s1204_s22 = scalar_lea.sflag (!%p299_p9), [#allocation3], %s334_s25  ;;  %s1848_s14 = int_to_ptr.vmem [resolvable:$true] %s1217_s14 }
  0x14   : > { %910 = vperm.xlu0 (!%p299_p9), %1443, %v900_v12   ;;  %s1449_s23 = scalar_lea.vmem (!%p299_p9), %s1848_s14, 64 }
  0x15   : > { %s338_s21 = scalar_select %p337_p10, %s1596_s13, 1  ;;  %920 = vperm.xlu1 %1444, %v902_v18  }
  0x16   : > { %p1450_p11 = scmp.ne.s32.totalorder %s1848_s14, %s1449_s23 }
  0x17   : > { %s1293_s26 = sshll.u32 %s338_s21, 2 }
  0x18   : > { %s340_s29 = scalar_lea.vmem %s1888_s0, %s1293_s26  ;;  %s344_s17 = scalar_lea.vmem %s1889_s1, %s1293_s26  ;;  %1189 = vperm.xlu0 %1443, %v1186_v19  }
  0x19   : > { %v345_v5 = vld [vmem:[%s344_s17] sm:$0xf]  ;;  %1197 = vperm.xlu1 %1444, %v1194_v23   ;;  %s1316_s26 = sshll.u32 %s1596_s13, 6  ;;  %p1451_p12 = pnand %p1450_p11, %p1613_p5 }
  0x1a   : > { %v1645_v6 = vld [vmem:[%s340_s29] sm:$0xf]  ;;  %1339 = vmatprep.subr.msk.mxu0 %vm571_vm1, %v345_v5  ;;  %1347 = vmatprep.subr.msk.mxu1 %vm571_vm1, %v345_v5  ;;  %s1846_s17 = scalar_lea.hbm %s1897_s9, %s1316_s26  ;;  %s1524_s13 = smov [#allocation2]  }
  0x1b   : > { %v350_v8 = vand.u32 2139095040, %v1645_v6  ;;  %1340 = vmatpush3.msk.msra.mxu0 %vm571_vm1, %v345_v5  ;;  %1348 = vmatpush3.msk.msra.mxu1 %vm571_vm1, %v345_v5  ;;  %v347_v14 = vand.u32 2147483647, %v1645_v6  ;;  %vm349_vm9 = vcmp.lt.s32.totalorder %v1645_v6, 0  ;;  %p1452_p13 = pneg %p1451_p12  ;;  %s1453_s21 = sshll.u32 %s1524_s13, 4  ;;  %s1454_s21 = int_to_ptr.vmem [resolvable:$false] %s1453_s21 }
  0x1c   : > { %1342 = vmatmul.mubr.msk.f32.vlgmr.msra.gmra.mrb[0].mxu0 %vm558_vm0, %v555_v2  ;;  %1350 = vmatmul.mubr.msk.f32.vlgmr.msra.gmra.mrb[0].mxu1 %vm558_vm0, %v661_v7  ;;  %s1455_s24 = scalar_lea.vmem %s1454_s21, 128  ;;  %p1456_p0 = scmp.lt.s32.totalorder %s1848_s14, %s1454_s21 }
  0x1d   : > { %v351_v13 = vshrl.u32 %v350_v8, 23  ;;  %1344 = vmatprep.mubr.msk.f32.mxu0 %vm558_vm0, %v556_v9  ;;  %1352 = vmatprep.mubr.msk.f32.mxu1 %vm558_vm0, %v662_v10  ;;  %v354_v21 = vand.u32 8388607, %v347_v14  ;;  %vm348_vm10 = vcmp.le.f32.partialorder %v347_v14, 0.7853982  ;;  %p1457_p1 = scmp.lt.s32.totalorder %s1455_s24, %s1449_s23 }
  0x1f   : > { %v1295_v17 = vadd.s32 4294967169, %v351_v13  ;;  %v355_v25 = vor.u32 8388608, %v354_v21  ;;  %p1458_p2 = por %p1457_p1, %p1456_p0 }
  0x20   : > { %1345 = vmatmul.mubr.msk.f32.gmra.mrb[2].mxu0 %vm558_vm0, %v557_v15  ;;  %1353 = vmatmul.mubr.msk.f32.gmra.mrb[2].mxu1 %vm558_vm0, %v663_v16 }
  0x21   : > { %v357_v20 = vadd.s32 1, %v1295_v17  ;;  %v395_v45 = vshll.u32 %v355_v25, 8  ;;  %p1459_p3 = pnand %p1458_p2, %p1452_p13 }
  0x23   : > { %vm358_vm2 = vcmp.gt.s32.totalorder %v357_v20, 0 }
  0x24   : > { %v359_v22 = vsel %vm358_vm2, %v357_v20, 0  ;;  %vm439_vm2 = vweird.f32 %v1645_v6 }
  0x25   : > { %v361_v24 = vand.u32 31, %v359_v22  ;;  %v360_v26 = vshrl.u32 %v359_v22, 5 }
  0x27   : > { %v362_v27 = vsub.s32 32, %v361_v24  ;;  %v364_v29 = vshll.u32 %v1514_v28, %v361_v24  ;;  %v367_v31 = vshll.u32 %v1515_v30, %v361_v24  ;;  %v370_v33 = vshll.u32 %v1516_v32, %v361_v24 }
  0x28   : > { %v373_v35 = vshll.u32 %v1517_v34, %v361_v24  ;;  %v376_v37 = vshll.u32 %v1518_v36, %v361_v24  ;;  %vm379_vm3 = vcmp.lt.s32.totalorder %v360_v26, 1  ;;  %vm382_vm4 = vcmp.lt.s32.totalorder %v360_v26, 4 }
  0x29   : > { %v363_v38 = vshrl.u32 %v1514_v28, %v362_v27  ;;  %v365_v39 = vshrl.u32 %v1515_v30, %v362_v27  ;;  %v368_v40 = vshrl.u32 %v1516_v32, %v362_v27  ;;  %v371_v41 = vshrl.u32 %v1517_v34, %v362_v27 }
  0x2a   : > { %v374_v42 = vshrl.u32 %v1518_v36, %v362_v27  ;;  %v377_v44 = vshrl.u32 %v1519_v43, %v362_v27  ;;  %vm380_vm5 = vcmp.lt.s32.totalorder %v360_v26, 2  ;;  %vm381_vm6 = vcmp.lt.s32.totalorder %v360_v26, 3 }
  0x2b   : > { %v366_v46 = vor.u32 %v365_v39, %v364_v29  ;;  %v369_v47 = vor.u32 %v368_v40, %v367_v31  ;;  %v372_v48 = vor.u32 %v371_v41, %v370_v33 }
  0x2c   : > { %v375_v49 = vor.u32 %v374_v42, %v373_v35  ;;  %v378_v50 = vor.u32 %v377_v44, %v376_v37 }
  0x2d   : > { %v383_v51 = vsel %vm379_vm3, %v363_v38, %v366_v46  ;;  %v384_v52 = vsel %vm382_vm4, %v372_v48, 2102212464  ;;  %v387_v53 = vsel %vm379_vm3, %v366_v46, %v369_v47  ;;  %v391_v54 = vsel %vm379_vm3, %v369_v47, %v372_v48 }
  0x2e   : > { %v385_v55 = vsel %vm381_vm6, %v369_v47, %v384_v52  ;;  %v388_v56 = vsel %vm382_vm4, %v375_v49, 920167782  ;;  %v392_v57 = vsel %vm382_vm4, %v378_v50, 1326507024  ;;  %v1520_v50 = vmov 0.0|0.0  }
  0x2f   : > { %v389_v58 = vsel %vm381_vm6, %v372_v48, %v388_v56  ;;  %v393_v59 = vsel %vm381_vm6, %v375_v49, %v392_v57  ;;  %v386_v60 = vsel %vm380_vm5, %v383_v51, %v385_v55  ;;  %1377 = vmatprep.subr.bf16.mxu0 %v1520_v50  ;;  %1383 = vmatprep.subr.bf16.mxu1 %v1520_v50  ;;  %vm1521_vm3 = vmmov 0  }
  0x30   : > { %v390_v61 = vsel %vm380_vm5, %v387_v53, %v389_v58  ;;  %v394_v62 = vsel %vm380_vm5, %v391_v54, %v393_v59  ;;  %v402_v3 = vmul.u32 %v395_v45, %v386_v60  ;;  %v1522_v51 = vmov 0.0  }
  0x31   : > { %v1691_v63 = vmul.u32.u64.low %v395_v45, %v394_v62  ;;  %v1692_v0 = vmul.u32.u64.high %v395_v45, %v394_v62, %v1691_v63  ;;  %v1694_v1 = vmul.u32.u64.low %v395_v45, %v390_v61  ;;  %v1695_v2 = vmul.u32.u64.high %v395_v45, %v390_v61, %v1694_v1  ;;  %1363 = vmatprep.mubr.msk.f32.mxu0 %vm1521_vm3, %v1522_v51  ;;  %1374 = vmatprep.mubr.msk.f32.mxu1 %vm1521_vm3, %v1522_v51 }
  0x32   : > { %v765_v53 = vlaneseq  ;;  %vm1037_vm4 = vcmask 261120  }
  0x33   : > { %vm404_vm7 = vc.u32 %v1692_v0, %v1694_v1  ;;  %v405_v4 = vadd.s32 1, %v1695_v2  ;;  %v403_v17 = vadd.s32 %v1694_v1, %v1692_v0 }
  0x34   : > { %v766_v55 = vshrl.u32 %v765_v53, 7 }
  0x35   : > { %v406_v5 = vsel %vm404_vm7, %v405_v4, %v1695_v2 }
  0x36   : > { %v407_v7 = vadd.s32 %v406_v5, %v402_v3  ;;  %v813_v3 = vsub.s32 0, %v766_v55 }
  0x38   : > { %v408_v8 = vadd.s32 536870912, %v407_v7 }
  0x3a   : > { %v409_v9 = vshrl.u32 %v408_v8, 30 }
  0x3c   : > { %v410_v10 = vshll.u32 %v409_v9, 30  ;;  %v433_v30 = vsub.s32 4, %v409_v9 }
  0x3e   : > { %v411_v11 = vsub.s32 %v407_v7, %v410_v10  ;;  %v434_v33 = vsel %vm349_vm9, %v433_v30, %v409_v9 }
  0x3f   : > { %v436_v35 = vsel %vm348_vm10, 0, %v434_v33 }
  0x40   : > { %v413_v12 = vsub.s32 0, %v411_v11  ;;  %v543_v36 = vadd.s32 3, %v436_v35  ;;  %v440_v37 = vand.u32 3, %v436_v35 }
  0x42   : > { %v1296_v13 = vmin.u32 %v413_v12, %v411_v11  ;;  %v544_v38 = vand.u32 3, %v543_v36  ;;  %vm445_vm11 = vcmp.eq.s32.totalorder %v440_v37, 2  ;;  %vm442_vm13 = vcmp.eq.s32.totalorder %v440_v37, 0 }
  0x43   : > { %vm441_vm15 = vcmp.lt.s32.totalorder %v440_v37, 2 }
  0x44   : > { %v415_v15 = vclz %v1296_v13  ;;  %vm549_vm12 = vcmp.eq.s32.totalorder %v544_v38, 2  ;;  %vm546_vm14 = vcmp.eq.s32.totalorder %v544_v38, 0  ;;  %vm545_vm0 = vcmp.lt.s32.totalorder %v544_v38, 2 }
  0x46   : > { %v1297_v16 = vadd.s32 4294967294, %v415_v15 }
  0x48   : > { %vm1298_vm8 = vcmp.lt.s32.totalorder %v1297_v16, 0 }
  0x49   : > { %v418_v18 = vsel %vm1298_vm8, 0, %v1297_v16 }
  0x4a   : > { %v419_v19 = vsub.s32 32, %v418_v18  ;;  %v420_v20 = vshll.u32 %v411_v11, %v418_v18  ;;  %v423_v21 = vsub.s32 4294967266, %v418_v18 }
  0x4c   : > { %v421_v22 = vshrl.u32 %v403_v17, %v419_v19  ;;  %v424_v23 = vadd.s32 127, %v423_v21 }
  0x4e   : > { %v422_v24 = vor.u32 %v421_v22, %v420_v20  ;;  %v425_v25 = vshll.u32 %v424_v23, 23 }
  0x50   : > { %v426_v26 = vor.u32 4788187, %v425_v25  ;;  %v429_v27 = vcvt.s32.f32 %v422_v24 }
  0x52   : > { %v427_v28 = vand.u32 2147483647, %v426_v26 }
  0x54   : > { %v430_v29 = vmul.f32 %v429_v27, %v427_v28 }
  0x56   : > { %v431_v31 = vxor.u32 2147483648, %v430_v29 }
  0x58   : > { %v432_v32 = vsel %vm349_vm9, %v431_v31, %v430_v29 }
  0x59   : > { %v435_v34 = vsel %vm348_vm10, %v1645_v6, %v432_v32  ;;  %v1523_v6 = vmov 1966171168  }
  0x5a   : > { %1445 = vcosq.f32 %v435_v34  ;;  %v763_v52 = vunpack.c.l.s4 %v1523_v6 }
  0x5b   : > { %1447 = vsinq.f32 %v435_v34 }
  0x5c   : > { %v764_v54 = vunpack.c.0.s8 %v763_v52 }
  0x5e   : > { %v767_v56 = vsub.s32 %v764_v54, %v766_v55 }
  0x64   : > { %v1446_v39 = vpop.eup %1445 }
  0x65   : > { %v1448_v40 = vpop.eup %1447  ;;  %v446_v41 = vxor.u32 2147483648, %v1446_v39 }
  0x66   : > { %v443_v14 = vxor.u32 2147483648, %v1448_v40 }
  0x67   : > { %v447_v42 = vsel %vm445_vm11, %v446_v41, %v1448_v40  ;;  %v551_v43 = vsel %vm549_vm12, %v446_v41, %v1448_v40 }
  0x68   : > { %v444_v44 = vsel %vm442_vm13, %v1446_v39, %v443_v14  ;;  %v548_v45 = vsel %vm546_vm14, %v1446_v39, %v443_v14 }
  0x69   : > { %v448_v46 = vsel %vm441_vm15, %v444_v44, %v447_v42  ;;  %v552_v47 = vsel %vm545_vm0, %v548_v45, %v551_v43 }
  0x6a   : > { %v1706_v48 = vsel %vm439_vm2, nan, %v448_v46  ;;  %v1708_v49 = vsel %vm439_vm2, nan, %v552_v47 }
  0x6b   : > { %v768_v57 = vrot.slane %v1706_v48, %v767_v56  ;;  %v793_v58 = vrot.slane %v1708_v49, %v767_v56 }
  0x6d   : > { %v769_v59 = vcombine.high %v768_v57, %v768_v57  ;;  %v794_v60 = vcombine.high %v793_v58, %v793_v58  ;;  %v776_v61 = vrot.slane %v768_v57, %v767_v56  ;;  %v801_v63 = vrot.slane %v793_v58, %v767_v56 }
  0x6f   : > { %v783_v62 = vrot.slane %v769_v59, %v767_v56  ;;  %v808_v0 = vrot.slane %v794_v60, %v767_v56  ;;  %v784_v1 = vcombine.high %v776_v61, %v776_v61  ;;  %v809_v4 = vcombine.high %v801_v63, %v801_v63 }
  0x70   : > { %v1714_v7 = vrot.slane %v776_v61, %v813_v3  ;;  %v1722_v12 = vrot.slane %v801_v63, %v813_v3 }
  0x71   : > { %v785_v2 = vcombine.high %v783_v62, %v783_v62  ;;  %v810_v5 = vcombine.high %v808_v0, %v808_v0  ;;  %v1716_v8 = vrot.slane %v783_v62, %v813_v3  ;;  %v1718_v9 = vrot.slane %v784_v1, %v813_v3 }
  0x72   : > { %v1724_v13 = vrot.slane %v808_v0, %v813_v3  ;;  %v1726_v15 = vrot.slane %v809_v4, %v813_v3 }
  0x73   : > { %v1720_v10 = vrot.slane %v785_v2, %v813_v3  ;;  %v1728_v16 = vrot.slane %v810_v5, %v813_v3 }
  0x8f   : > { %v906_v11 = vpop.permute.xlu0 %905 }
  0x93   : > { %v911_v29 = vpop.permute.xlu0 %910 }
  0xef   : > { %v1343_v17 = vpop.f32.mrb[0].mxu0  ;;  %v1351_v18 = vpop.f32.mrb[0].mxu1 }
  0xf0   : > { %v832_v19 = vmul.f32 %v1343_v17, %v1714_v7  ;;  %v836_v20 = vmul.f32 %v1343_v17, %v1716_v8  ;;  %v840_v21 = vmul.f32 %v1343_v17, %v1718_v9  ;;  %v844_v22 = vmul.f32 %v1343_v17, %v1720_v10  ;;  %v641_v23 = vpop.f32.mrb[1].mxu0  ;;  %v742_v24 = vpop.f32.mrb[1].mxu1 }
  0xf1   : > { %v868_v25 = vmul.f32 %v1351_v18, %v1722_v12  ;;  %v872_v26 = vmul.f32 %v1351_v18, %v1724_v13  ;;  %v876_v27 = vmul.f32 %v1351_v18, %v1726_v15  ;;  %v880_v28 = vmul.f32 %v1351_v18, %v1728_v16  ;;  %v916_v17 = vpop.permute.xlu1 %915 }
  0xf2   : > { %v831_v30 = vmul.f32 %v1714_v7, %v641_v23  ;;  %v835_v31 = vmul.f32 %v1716_v8, %v641_v23  ;;  %v839_v32 = vmul.f32 %v1718_v9, %v641_v23  ;;  %v843_v33 = vmul.f32 %v1720_v10, %v641_v23 }
  0xf3   : > { %v884_v34 = vadd.f32 %v868_v25, %v832_v19  ;;  %v888_v35 = vadd.f32 %v872_v26, %v836_v20  ;;  %v892_v36 = vadd.f32 %v876_v27, %v840_v21  ;;  %v896_v37 = vadd.f32 %v880_v28, %v844_v22  ;;  %v1346_v38 = vpop.f32.mrb[2].mxu0  ;;  %v1354_v39 = vpop.f32.mrb[2].mxu1 }
  0xf4   : > { %v867_v40 = vmul.f32 %v1722_v12, %v742_v24  ;;  %v871_v41 = vmul.f32 %v1724_v13, %v742_v24  ;;  %v875_v14 = vmul.f32 %v1726_v15, %v742_v24  ;;  %v879_v42 = vmul.f32 %v1728_v16, %v742_v24  ;;  %v651_v43 = vpop.f32.mrb[3].mxu0  ;;  %v752_v44 = vpop.f32.mrb[3].mxu1 }
  0xf5   : > { %v924_v45 = vadd.f32 %v911_v29, %v884_v34  ;;  %v928_v46 = vadd.f32 %v911_v29, %v888_v35  ;;  %v932_v47 = vadd.f32 %v911_v29, %v892_v36  ;;  %v1746_v51 = vadd.f32 %v911_v29, %v896_v37 }
  0xf6   : > { %v883_v6 = vadd.f32 %v867_v40, %v831_v30  ;;  %v887_v52 = vadd.f32 %v871_v41, %v835_v31  ;;  %v891_v53 = vadd.f32 %v875_v14, %v839_v32  ;;  %v895_v54 = vadd.f32 %v879_v42, %v843_v33  ;;  %v921_v42 = vpop.permute.xlu1 %920 }
  0xf7   : > { %v940_v55 = vmax.f32 %v924_v45, 0.0  ;;  %v944_v56 = vmax.f32 %v928_v46, 0.0  ;;  %v948_v57 = vmax.f32 %v932_v47, 0.0  ;;  %v952_v58 = vmax.f32 %v1746_v51, 0.0 }
  0xf8   : > { %v923_v59 = vadd.f32 %v906_v11, %v883_v6  ;;  %v927_v60 = vadd.f32 %v906_v11, %v887_v52  ;;  %v931_v61 = vadd.f32 %v906_v11, %v891_v53  ;;  %v1749_v62 = vadd.f32 %v906_v11, %v895_v54 }
  0xf9   : > { %v1752_v63 = vmul.f32 %v940_v55, %v1714_v7  ;;  %v1755_v0 = vmul.f32 %v944_v56, %v1716_v8  ;;  %v1758_v1 = vmul.f32 %v948_v57, %v1718_v9  ;;  %v1761_v2 = vmul.f32 %v940_v55, %v1722_v12 }
  0xfa   : > { %v1764_v3 = vmul.f32 %v944_v56, %v1724_v13  ;;  %v1767_v4 = vmul.f32 %v948_v57, %v1726_v15  ;;  %v939_v5 = vmax.f32 %v923_v59, 0.0  ;;  %v943_v11 = vmax.f32 %v927_v60, 0.0 }
  0xfb   : > { %v947_v18 = vmax.f32 %v931_v61, 0.0  ;;  %v951_v19 = vmax.f32 %v1749_v62, 0.0  ;;  %v834_v20 = vmul.f32 %v1346_v38, %v1714_v7  ;;  %v838_v21 = vmul.f32 %v1346_v38, %v1716_v8 }
  0xfc   : > { %v955_v22 = vmul.f32 %v939_v5, %v1714_v7  ;;  %v959_v23 = vmul.f32 %v943_v11, %v1716_v8  ;;  %v988_v24 = vmul.f32 %v939_v5, %v1722_v12  ;;  %v992_v25 = vmul.f32 %v943_v11, %v1724_v13 }
  0xfd   : > { %v963_v26 = vmul.f32 %v947_v18, %v1718_v9  ;;  %v1778_v27 = vmul.f32 %v947_v18, %v1726_v15  ;;  %v842_v28 = vmul.f32 %v1346_v38, %v1718_v9  ;;  %v846_v29 = vmul.f32 %v1346_v38, %v1720_v10 }
  0xfe   : > { %v870_v30 = vmul.f32 %v1354_v39, %v1722_v12  ;;  %v874_v31 = vmul.f32 %v1354_v39, %v1724_v13  ;;  %v878_v32 = vmul.f32 %v1354_v39, %v1726_v15  ;;  %v882_v33 = vmul.f32 %v1354_v39, %v1728_v16 }
  0xff   : > { %v833_v34 = vmul.f32 %v1714_v7, %v651_v43  ;;  %v837_v35 = vmul.f32 %v1716_v8, %v651_v43  ;;  %v841_v36 = vmul.f32 %v1718_v9, %v651_v43  ;;  %v845_v37 = vmul.f32 %v1720_v10, %v651_v43 }
 0x100   : > { %v886_v40 = vadd.f32 %v870_v30, %v834_v20  ;;  %v890_v41 = vadd.f32 %v874_v31, %v838_v21  ;;  %v894_v14 = vadd.f32 %v878_v32, %v842_v28  ;;  %v898_v38 = vadd.f32 %v882_v33, %v846_v29 }
 0x101   : > { %v869_v45 = vmul.f32 %v1722_v12, %v752_v44  ;;  %v873_v46 = vmul.f32 %v1724_v13, %v752_v44  ;;  %v877_v47 = vmul.f32 %v1726_v15, %v752_v44  ;;  %v881_v39 = vmul.f32 %v1728_v16, %v752_v44 }
 0x102   : > { %v926_v6 = vadd.f32 %v921_v42, %v886_v40  ;;  %v930_v52 = vadd.f32 %v921_v42, %v890_v41  ;;  %v934_v53 = vadd.f32 %v921_v42, %v894_v14  ;;  %v938_v54 = vadd.f32 %v921_v42, %v898_v38 }
 0x103   : > { %v885_v55 = vadd.f32 %v869_v45, %v833_v34  ;;  %v889_v56 = vadd.f32 %v873_v46, %v837_v35  ;;  %v893_v43 = vadd.f32 %v877_v47, %v841_v36  ;;  %v897_v57 = vadd.f32 %v881_v39, %v845_v37 }
 0x104   : > { %v942_v59 = vmax.f32 %v926_v6, 0.0  ;;  %v946_v60 = vmax.f32 %v930_v52, 0.0  ;;  %v950_v61 = vmax.f32 %v934_v53, 0.0  ;;  %v954_v5 = vmax.f32 %v938_v54, 0.0 }
 0x105   : > { %v925_v11 = vadd.f32 %v916_v17, %v885_v55  ;;  %v929_v18 = vadd.f32 %v916_v17, %v889_v56  ;;  %v933_v20 = vadd.f32 %v916_v17, %v893_v43  ;;  %v937_v21 = vadd.f32 %v916_v17, %v897_v57 }
 0x106   : > { %v958_v28 = vmul.f32 %v942_v59, %v1714_v7  ;;  %v962_v44 = vmul.f32 %v946_v60, %v1716_v8  ;;  %v966_v29 = vmul.f32 %v950_v61, %v1718_v9  ;;  %v991_v30 = vmul.f32 %v942_v59, %v1722_v12 }
 0x107   : > { %v995_v31 = vmul.f32 %v946_v60, %v1724_v13  ;;  %v999_v32 = vmul.f32 %v950_v61, %v1726_v15  ;;  %v941_v33 = vmax.f32 %v925_v11, 0.0  ;;  %v945_v34 = vmax.f32 %v929_v18, 0.0 }
 0x108   : > { %v949_v35 = vmax.f32 %v933_v20, 0.0  ;;  %v953_v36 = vmax.f32 %v937_v21, 0.0  ;;  %v967_v17 = vmul.f32 %v951_v19, %v1720_v10  ;;  %v968_v37 = vmul.f32 %v952_v58, %v1720_v10  ;;  %v1036_v21 = vld [vmem:[%s1893_s5] sm:$0xf] }
 0x109   : > { %v957_v40 = vmul.f32 %v941_v33, %v1714_v7  ;;  %v961_v41 = vmul.f32 %v945_v34, %v1716_v8  ;;  %v990_v14 = vmul.f32 %v941_v33, %v1722_v12  ;;  %v994_v38 = vmul.f32 %v945_v34, %v1724_v13 }
 0x10a   : > { %v965_v42 = vmul.f32 %v949_v35, %v1718_v9  ;;  %v998_v45 = vmul.f32 %v949_v35, %v1726_v15  ;;  %v971_v46 = vadd.f32 %v959_v23, %v955_v22  ;;  %v974_v47 = vadd.f32 %v1755_v0, %v1752_v63 }
 0x10b   : > { %v1000_v39 = vmul.f32 %v951_v19, %v1728_v16  ;;  %v1001_v7 = vmul.f32 %v952_v58, %v1728_v16  ;;  %v1004_v8 = vadd.f32 %v992_v25, %v988_v24  ;;  %v1007_v12 = vadd.f32 %v1764_v3, %v1761_v2 }
 0x10c   : > { %v972_v13 = vadd.f32 %v971_v46, %v963_v26  ;;  %v975_v9 = vadd.f32 %v974_v47, %v1758_v1  ;;  %v969_v15 = vmul.f32 %v953_v36, %v1720_v10  ;;  %v970_v22 = vmul.f32 %v954_v5, %v1720_v10 }
 0x10d   : > { %v1005_v63 = vadd.f32 %v1004_v8, %v1778_v27  ;;  %v1008_v62 = vadd.f32 %v1007_v12, %v1767_v4  ;;  %v977_v0 = vadd.f32 %v961_v41, %v957_v40  ;;  %v980_v19 = vadd.f32 %v962_v44, %v958_v28  ;;  %v1111_v28 = vld [vmem:[%s1894_s6] sm:$0xf] }
 0x10e   : > { %v973_v23 = vadd.f32 %v972_v13, %v967_v17  ;;  %v976_v51 = vadd.f32 %v975_v9, %v968_v37  ;;  %v1002_v58 = vmul.f32 %v953_v36, %v1728_v16  ;;  %v1003_v24 = vmul.f32 %v954_v5, %v1728_v16 }
 0x10f   : > { %v1006_v2 = vadd.f32 %v1005_v63, %v1000_v39  ;;  %v1009_v3 = vadd.f32 %v1008_v62, %v1001_v7  ;;  %v978_v25 = vadd.f32 %v977_v0, %v965_v42  ;;  %v981_v1 = vadd.f32 %v980_v19, %v966_v29 }
 0x110   : > { %v984_v26 = vmul.f32 0.25, %v973_v23  ;;  %v985_v6 = vmul.f32 0.25, %v976_v51  ;;  %v1010_v52 = vadd.f32 %v994_v38, %v990_v14  ;;  %v1013_v10 = vadd.f32 %v995_v31, %v991_v30 }
 0x111   : > { %v1016_v53 = vmul.f32 0.25, %v1006_v2  ;;  %v1017_v27 = vmul.f32 0.25, %v1009_v3  ;;  %v979_v54 = vadd.f32 %v978_v25, %v969_v15  ;;  %v982_v4 = vadd.f32 %v981_v1, %v970_v22 }
 0x112   : > { %v1378_v55 = vpack.c.bf16 %v985_v6, %v984_v26  ;;  %v1011_v56 = vadd.f32 %v1010_v52, %v998_v45  ;;  %v1014_v43 = vadd.f32 %v1013_v10, %v999_v32  ;;  %v1028_v44 = vsel %vm571_vm1, %v1708_v49, 0.0  ;;  %v1198_v45 = vpop.permute.xlu1 %1197 }
 0x113   : > { %v1384_v57 = vpack.c.bf16 %v1017_v27, %v1016_v53  ;;  %v986_v59 = vmul.f32 0.25, %v979_v54  ;;  %v987_v60 = vmul.f32 0.25, %v982_v4  ;;  %v1029_v30 = vrot.slane %v1028_v44, 4 }
 0x114   : > { %1379 = vmatpush3.bf16.msra.mxu0 %v1378_v55  ;;  %v1012_v16 = vadd.f32 %v1011_v56, %v1002_v58  ;;  %v1015_v61 = vadd.f32 %v1014_v43, %v1003_v24 }
 0x115   : > { %1385 = vmatpush3.bf16.msra.mxu1 %v1384_v57  ;;  %1380 = vmatprep.subr.bf16.mxu0 %v1520_v50  ;;  %v1381_v5 = vpack.c.bf16 %v987_v60, %v986_v59  ;;  %v1030_v32 = vadd.f32 %v1029_v30, %v1028_v44 }
 0x116   : > { %1386 = vmatprep.subr.bf16.mxu1 %v1520_v50  ;;  %v1018_v11 = vmul.f32 0.25, %v1012_v16  ;;  %v1019_v18 = vmul.f32 0.25, %v1015_v61  ;;  %v1020_v50 = vsel %vm571_vm1, %v1706_v48, 0.0  ;;  %v1190_v48 = vpop.permute.xlu0 %1189 }
 0x117   : > { %v1021_v29 = vrot.slane %v1020_v50, 4  ;;  %v1031_v34 = vrot.slane %v1030_v32, 2 }
 0x118   : > { %1382 = vmatpush3.bf16.msra.mxu0 %v1381_v5  ;;  %v1387_v20 = vpack.c.bf16 %v1019_v18, %v1018_v11 }
 0x119   : > { %v1022_v31 = vadd.f32 %v1021_v29, %v1020_v50  ;;  %v1032_v36 = vadd.f32 %v1031_v34, %v1030_v32 }
 0x11a   : > { %1388 = vmatpush3.bf16.msra.mxu1 %v1387_v20 }
 0x11b   : > { %1364 = vmatmul.mubr.msk.f32.vlgmr.msra.gmra.mrb[4].mxu0 %vm1037_vm4, %v1036_v21  ;;  %v1023_v33 = vrot.slane %v1022_v31, 2  ;;  %v1033_v37 = vrot.slane %v1032_v36, 1 }
 0x11d   : > { %1375 = vmatmul.mubr.msk.f32.vlgmr.msra.gmra.mrb[4].mxu1 %vm1037_vm4, %v1111_v28  ;;  %v1024_v35 = vadd.f32 %v1023_v33, %v1022_v31  ;;  %v1034_v41 = vadd.f32 %v1033_v37, %v1032_v36 }
 0x11f   : > { %v1025_v17 = vrot.slane %v1024_v35, 1  ;;  %v1035_v42 = vmul.f32 0.25, %v1034_v41 }
 0x121   : > { %v1026_v40 = vadd.f32 %v1025_v17, %v1024_v35  ;;  %v1200_v8 = vmul.f32 %v1198_v45, %v1035_v42 }
 0x123   : > { %v1027_v14 = vmul.f32 0.25, %v1026_v40 }
 0x125   : > { %v1192_v47 = vmul.f32 %v1190_v48, %v1027_v14 }
 0x1ee   : > { %v1107_v38 = vpop.f32.mrb[4].mxu0 }
 0x1ef   : > { %v1365_v49 = vpop.f32.mrb[5].mxu0 }
 0x1f0   : > { %v1181_v46 = vpop.f32.mrb[4].mxu1 }
 0x1f1   : > { %v1185_v39 = vsub.f32 %v1107_v38, %v1181_v46  ;;  %v1376_v7 = vpop.f32.mrb[5].mxu1 }
 0x1f3   : > { %v1193_v12 = vadd.f32 %v1192_v47, %v1185_v39 }
 0x1f5   : > { %v1201_v13 = vsub.f32 %v1193_v12, %v1200_v8 }
 0x1f7   : > { %1202 = vst [vmem:[%s336_s28] sm:$0xf] %v1201_v13 }
 0x1f8   : > { %1462 = shalt.err (!%p1459_p3)
}
 0x1f9   : > { %s1463_s25 = scalar_lea.hbm %s1846_s17, 64  ;;  %s1467_s28 = scalar_lea.hbm %s1897_s9, 128 }
 0x1fa   : > { %p1464_p4 = scmp.ne.s32.totalorder %s1846_s17, %s1463_s25  ;;  %p1468_p9 = scmp.lt.u32.totalorder %s1846_s17, %s1897_s9 }
 0x1fb   : > { %p1469_p10 = scmp.lt.u32.totalorder %s1467_s28, %s1463_s25  ;;  %p1471_p12 = scmp.lt.u32.totalorder %s1463_s25, %s1846_s17 }
 0x1fc   : > { %p1465_p7 = pnand %p1464_p4, %p1613_p5 }
 0x1fd   : > { %p1470_p11 = por %p1469_p10, %p1468_p9 }
 0x1fe   : > { %p1466_p8 = pneg %p1465_p7 }
 0x1ff   : > { %p1472_p13 = por %p1471_p12, %p1470_p11 }
 0x201   : > { %p1473_p0 = pnand %p1472_p13, %p1466_p8 }
 0x203   : > { %1476 = shalt.err (!%p1473_p0)
}
 0x204   : > { %1393 = dma.vmem_to_hbm [thread:$0]  (%p1613_p5), %s1848_s14, 64, %s1846_s17, %s1204_s22  }
 0x205 PF: > { %p1399_p1 = scmp.ge.s32.totalorder %s1511_s12, 2  ;;  %s1229_s23 = sand.u32 1, %s1499_s30  }
 0x206   : > { %s1230_s13 = scalar_lea.sflag [#allocation3], %s1229_s23 }
 0x207   : > { %p1396_p2 = pnand %p1399_p1, %p1617_p6 }
 0x209   : > { %1494 = dma.done.wait (!%p1396_p2), %s1230_s13, 64  }
 0x20a   : > { %1496 = vsyncadd (!%p1396_p2), %s1230_s13, 4294967232  ;;  %p19_p3 = scmp.ge.s32.totalorder %s1600_s15, 4   ;;  %s1900_s30 = smov %s1503_s10 }
 0x20b   : > { %s1901_s10 = smov %s1507_s11  ;;  %s1902_s11 = smov %s1611_s18 }
 0x20c   : > { %s1903_s12 = smov %s1600_s15  ;;  %21 = sbr.rel (!%p19_p3) target bundleno = 3 (0x3), region = 94 }
 0x213   :  { %1235 = vsyncpa [#allocation3], 1 }
 0x214   :  { %1237 = vsyncpa [#allocation3 + $0x1], 1 }

</bundles_post_ra>
